<compile_context>
chip_gen: v6e
topology: v6e:2x2x1
jax: 0.10.0
libtpu: 0.0.40
codegen_flags: <defaults>
</compile_context>

<pallas_src>
import jax
import jax.numpy as jnp
from jax import lax
from jax.experimental import pallas as pl
from jax.experimental.pallas import tpu as pltpu


# --------------------------------------------------------------------------- #
# Single-tile path (small K, D): normalize + gram + hinge reduction in one shot
# --------------------------------------------------------------------------- #
def _make_small_kernel(margin):
    margin = float(margin)

    def kernel(ws_ref, loss_ref):
        ws = ws_ref[...].astype(jnp.float32)                 # (K, D)
        K = ws.shape[0]

        # F.normalize(ws, dim=1): x / max(||x||, 1e-12)  ==  x * rsqrt(max(||x||^2, 1e-24))
        sumsq = jnp.sum(ws * ws, axis=1, keepdims=True)      # (K, 1)
        inv = lax.rsqrt(jnp.maximum(sumsq, jnp.float32(1e-24)))
        wsn = ws * inv

        # NT gram matmul on the MXU (contract D of both operands, no transpose).
        gram = lax.dot_general(
            wsn, wsn,
            dimension_numbers=(((1,), (1,)), ((), ())),
            preferred_element_type=jnp.float32)              # (K, K)

        m = jnp.float32(margin)
        t = m - 0.5 * (1.0 - gram)
        h = jnp.maximum(t, 0.0)
        total_all = jnp.sum(jnp.sum(h * h, axis=1, keepdims=True))

        # Analytic diagonal correction: torch zeroes diag(cos_dis) exactly, so each
        # diagonal entry must contribute max(margin, 0)^2.  Subtract what the raw
        # gram diagonal (= ||wsn_i||^2 ~= 1) actually contributed above.
        diag_g = jnp.sum(wsn * wsn, axis=1, keepdims=True)   # (K, 1)
        t_d = m - 0.5 * (1.0 - diag_g)
        h_d = jnp.maximum(t_d, 0.0)
        diag_sub = jnp.sum(h_d * h_d)

        m_h = max(margin, 0.0)
        total = total_all - diag_sub + jnp.float32(K * m_h * m_h)
        loss_ref[0, 0] = total / jnp.float32(K * K)

    return kernel


def _spread_loss_single(ws, margin):
    K, D = ws.shape
    # Rough VMEM need (f32): ws + normalized copy + a couple of KxK intermediates.
    approx_need = 4 * (2 * K * D + 2 * K * K) + (1 << 20)
    cp = None
    if approx_need > (12 << 20):
        # v5e's default scoped VMEM is only 16 MiB; raise the cap (stay under v7x's 64 MiB).
        cp = pltpu.CompilerParams(vmem_limit_bytes=min(2 * approx_need, 60 << 20))
    out = pl.pallas_call(
        _make_small_kernel(margin),
        out_shape=jax.ShapeDtypeStruct((1, 1), jnp.float32),
        in_specs=[pl.BlockSpec(memory_space=pltpu.MemorySpace.VMEM)],
        out_specs=pl.BlockSpec(memory_space=pltpu.MemorySpace.SMEM),
        compiler_params=cp,
    )(ws)
    return out[0, 0]


# --------------------------------------------------------------------------- #
# Gridded path (large K): normalize pre-pass + tiled gram/hinge reduction
# --------------------------------------------------------------------------- #
def _make_normalize_kernel(margin):
    margin = float(margin)

    def kernel(ws_ref, wsn_ref, dsum_ref):
        ws = ws_ref[...].astype(jnp.float32)                 # (br, D)
        sumsq = jnp.sum(ws * ws, axis=1, keepdims=True)
        inv = lax.rsqrt(jnp.maximum(sumsq, jnp.float32(1e-24)))
        wsn = ws * inv
        wsn_ref[...] = wsn

        # Per-row hinge term of the raw gram diagonal for the analytic correction.
        diag_g = jnp.sum(wsn * wsn, axis=1, keepdims=True)   # (br, 1), ~= 1
        t_d = jnp.float32(margin) - 0.5 * (1.0 - diag_g)
        h_d = jnp.maximum(t_d, 0.0)

        @pl.when(pl.program_id(0) == 0)
        def _():
            dsum_ref[...] = jnp.zeros_like(dsum_ref)

        dsum_ref[...] += jnp.sum(h_d * h_d, axis=0, keepdims=True)   # (1, 1)

    return kernel


def _make_gram_kernel(margin, use_bf16):
    margin = float(margin)

    def kernel(lhs_ref, rhs_ref, out_ref):
        i = pl.program_id(0)
        j = pl.program_id(1)

        @pl.when(jnp.logical_and(i == 0, j == 0))
        def _():
            out_ref[...] = jnp.zeros_like(out_ref)

        lhs = lhs_ref[...]
        rhs = rhs_ref[...]
        if use_bf16:  # optional bf16 MXU feed (v6e/v7x); ~1e-3 cosine error, off by default
            lhs = lhs.astype(jnp.bfloat16)
            rhs = rhs.astype(jnp.bfloat16)

        gram = lax.dot_general(
            lhs, rhs,
            dimension_numbers=(((1,), (1,)), ((), ())),
            preferred_element_type=jnp.float32)              # (bm, bn)

        t = jnp.float32(margin) - 0.5 * (1.0 - gram)
        h = jnp.maximum(t, 0.0)
        rowsum = jnp.sum(h * h, axis=1, keepdims=True)       # (bm, 1)
        out_ref[...] += jnp.sum(rowsum, axis=0, keepdims=True)  # (1, 1)

    return kernel


def _spread_loss_tiled(ws, margin, block_rows, use_bf16_gram):
    K, D = ws.shape
    br = block_rows
    grid_r = K // br

    # Pass 1: normalize each row exactly once; also reduce the diag-correction term.
    wsn, dsum = pl.pallas_call(
        _make_normalize_kernel(margin),
        out_shape=(jax.ShapeDtypeStruct((K, D), jnp.float32),
                   jax.ShapeDtypeStruct((1, 1), jnp.float32)),
        grid=(grid_r,),
        in_specs=[pl.BlockSpec((br, D), lambda i: (i, 0))],
        out_specs=(pl.BlockSpec((br, D), lambda i: (i, 0)),
                   pl.BlockSpec((1, 1), lambda i: (0, 0))),
        compiler_params=pltpu.CompilerParams(dimension_semantics=("arbitrary",)),
    )(ws)

    # Pass 2: tiled (K/br, K/br) gram + hinge-square sum into a resident scalar block.
    # TODO(synk): per-row-block partial outputs would let the i axis be "parallel"
    #             for v7x megacore; kept as a single scalar accumulator for simplicity.
    total = pl.pallas_call(
        _make_gram_kernel(margin, use_bf16_gram),
        out_shape=jax.ShapeDtypeStruct((1, 1), jnp.float32),
        grid=(grid_r, grid_r),
        in_specs=[pl.BlockSpec((br, D), lambda i, j: (i, 0)),
                  pl.BlockSpec((br, D), lambda i, j: (j, 0))],
        out_specs=pl.BlockSpec((1, 1), lambda i, j: (0, 0)),
        compiler_params=pltpu.CompilerParams(
            dimension_semantics=("arbitrary", "arbitrary")),
    )(wsn, wsn)

    m_h = max(float(margin), 0.0)
    loss = (total[0, 0] - dsum[0, 0] + jnp.float32(K * m_h * m_h)) / jnp.float32(K * K)
    return loss


# --------------------------------------------------------------------------- #
# Public entry point
# --------------------------------------------------------------------------- #
def spread_loss(ws, margin, *, block_rows=256, use_bf16_gram=False):
    """Forward pass of fedaws SpreadModel. `margin` is a static Python float."""
    ws = jnp.asarray(ws, jnp.float32)
    K, D = ws.shape
    margin = float(margin)
    if K % block_rows == 0 and K > block_rows:
        return _spread_loss_tiled(ws, margin, block_rows, use_bf16_gram)
    return _spread_loss_single(ws, margin)


# --------------------------------------------------------------------------- #
# Pure-JAX reference mirroring the PyTorch forward exactly
# --------------------------------------------------------------------------- #
def _spread_loss_ref(ws, margin):
    ws = ws.astype(jnp.float32)
    norm = jnp.sqrt(jnp.sum(ws * ws, axis=1, keepdims=True))
    ws_n = ws / jnp.maximum(norm, 1e-12)
    gram = jnp.dot(ws_n, ws_n.T, precision=lax.Precision.HIGHEST)
    cos_dis = 0.5 * (1.0 - gram)
    K = ws.shape[0]
    cos_dis = cos_dis * (1.0 - jnp.eye(K, dtype=ws.dtype))
    t = jnp.float32(margin) - cos_dis
    indx = (t > 0.0).astype(ws.dtype)
    return jnp.mean((t * indx) ** 2)


if __name__ == "__main__":
    key = jax.random.PRNGKey(0)
    k_small, k_large = jax.random.split(key)

    # Small case (single-tile path), matching the module's typical tiny size.
    K, D = 8, 32
    margin = 0.5
    ws_small = jax.random.normal(k_small, (K, D), dtype=jnp.float32)
    loss_small = spread_loss(ws_small, margin)
    jax.block_until_ready(loss_small)
    ref_small = _spread_loss_ref(ws_small, margin)
    assert jnp.allclose(loss_small, ref_small, rtol=1e-5, atol=1e-5), (loss_small, ref_small)

    # Larger case exercising the gridded (normalize pre-pass + tiled gram) path.
    K2, D2 = 512, 256
    margin2 = 0.6
    ws_large = jax.random.normal(k_large, (K2, D2), dtype=jnp.float32)
    loss_large = spread_loss(ws_large, margin2)
    jax.block_until_ready(loss_large)
    ref_large = _spread_loss_ref(ws_large, margin2)
    assert jnp.allclose(loss_large, ref_large, rtol=1e-5, atol=1e-5), (loss_large, ref_large)

    print("KERNEL_OK")
</pallas_src>

<mosaic_0001>
module attributes {stable_mosaic.version = 11 : i64} {
  func.func @kernel(%arg0: memref<8x32xf32, #tpu.memory_space<vmem>>, %arg1: memref<1x1xf32, #tpu.memory_space<smem>>) attributes {dimension_semantics = [], scalar_prefetch = 0 : i64, scratch_operands = 0 : i64, tpu.core_type = #tpu.core_type<tc>} {
    %c0 = arith.constant 0 : index
    %c0_0 = arith.constant 0 : index
    %0 = vector.load %arg0[%c0, %c0_0] : memref<8x32xf32, #tpu.memory_space<vmem>>, vector<8x32xf32>
    %1 = arith.mulf %0, %0 : vector<8x32xf32>
    %cst = arith.constant dense<0.000000e+00> : vector<8xf32>
    %2 = vector.multi_reduction <add>, %1, %cst [1] : vector<8x32xf32> to vector<8xf32>
    %3 = vector.shape_cast %2 : vector<8xf32> to vector<8x1xf32>
    %cst_1 = arith.constant 1.000000e-24 : f32
    %4 = vector.broadcast %cst_1 : f32 to vector<8x1xf32>
    %5 = arith.maximumf %3, %4 : vector<8x1xf32>
    %6 = math.rsqrt %5 : vector<8x1xf32>
    %7 = vector.broadcast %6 : vector<8x1xf32> to vector<8x32xf32>
    %8 = arith.mulf %0, %7 : vector<8x32xf32>
    %cst_2 = arith.constant dense<0.000000e+00> : vector<8x8xf32>
    %9 = tpu.matmul %8, %8, %cst_2 {dimension_numbers = #tpu.dot_dimension_numbers<[1], [1], [0], [0], [0, 0, 1, 0], [], []>} : vector<8x32xf32>, vector<8x32xf32>, vector<8x8xf32> -> vector<8x8xf32>
    %cst_3 = arith.constant 1.000000e+00 : f32
    %10 = vector.broadcast %cst_3 : f32 to vector<8x8xf32>
    %11 = arith.subf %10, %9 : vector<8x8xf32>
    %cst_4 = arith.constant 5.000000e-01 : f32
    %12 = vector.broadcast %cst_4 : f32 to vector<8x8xf32>
    %13 = arith.mulf %12, %11 : vector<8x8xf32>
    %cst_5 = arith.constant 5.000000e-01 : f32
    %14 = vector.broadcast %cst_5 : f32 to vector<8x8xf32>
    %15 = arith.subf %14, %13 : vector<8x8xf32>
    %cst_6 = arith.constant 0.000000e+00 : f32
    %16 = vector.broadcast %cst_6 : f32 to vector<8x8xf32>
    %17 = arith.maximumf %15, %16 : vector<8x8xf32>
    %18 = arith.mulf %17, %17 : vector<8x8xf32>
    %cst_7 = arith.constant dense<0.000000e+00> : vector<8xf32>
    %19 = vector.multi_reduction <add>, %18, %cst_7 [1] : vector<8x8xf32> to vector<8xf32>
    %20 = vector.shape_cast %19 : vector<8xf32> to vector<8x1xf32>
    %21 = vector.shape_cast %20 : vector<8x1xf32> to vector<1x8x1xf32>
    %cst_8 = arith.constant dense<0.000000e+00> : vector<1xf32>
    %22 = vector.multi_reduction <add>, %21, %cst_8 [1, 2] : vector<1x8x1xf32> to vector<1xf32>
    %23 = vector.shape_cast %22 : vector<1xf32> to vector<1x1x1xf32>
    %24 = vector.extract %23[0, 0, 0] : f32 from vector<1x1x1xf32>
    %25 = arith.mulf %8, %8 : vector<8x32xf32>
    %cst_9 = arith.constant dense<0.000000e+00> : vector<8xf32>
    %26 = vector.multi_reduction <add>, %25, %cst_9 [1] : vector<8x32xf32> to vector<8xf32>
    %27 = vector.shape_cast %26 : vector<8xf32> to vector<8x1xf32>
    %cst_10 = arith.constant 1.000000e+00 : f32
    %28 = vector.broadcast %cst_10 : f32 to vector<8x1xf32>
    %29 = arith.subf %28, %27 : vector<8x1xf32>
    %cst_11 = arith.constant 5.000000e-01 : f32
    %30 = vector.broadcast %cst_11 : f32 to vector<8x1xf32>
    %31 = arith.mulf %30, %29 : vector<8x1xf32>
    %cst_12 = arith.constant 5.000000e-01 : f32
    %32 = vector.broadcast %cst_12 : f32 to vector<8x1xf32>
    %33 = arith.subf %32, %31 : vector<8x1xf32>
    %cst_13 = arith.constant 0.000000e+00 : f32
    %34 = vector.broadcast %cst_13 : f32 to vector<8x1xf32>
    %35 = arith.maximumf %33, %34 : vector<8x1xf32>
    %36 = arith.mulf %35, %35 : vector<8x1xf32>
    %37 = vector.shape_cast %36 : vector<8x1xf32> to vector<1x8x1xf32>
    %cst_14 = arith.constant dense<0.000000e+00> : vector<1xf32>
    %38 = vector.multi_reduction <add>, %37, %cst_14 [1, 2] : vector<1x8x1xf32> to vector<1xf32>
    %39 = vector.shape_cast %38 : vector<1xf32> to vector<1x1x1xf32>
    %40 = vector.extract %39[0, 0, 0] : f32 from vector<1x1x1xf32>
    %41 = arith.subf %24, %40 : f32
    %cst_15 = arith.constant 2.000000e+00 : f32
    %42 = arith.addf %41, %cst_15 : f32
    %cst_16 = arith.constant 6.400000e+01 : f32
    %43 = arith.divf %42, %cst_16 : f32
    %c0_17 = arith.constant 0 : index
    %c0_18 = arith.constant 0 : index
    %44 = memref.load %arg1[%c0_17, %c0_18] : memref<1x1xf32, #tpu.memory_space<smem>>
    memref.store %43, %arg1[%c0_17, %c0_18] : memref<1x1xf32, #tpu.memory_space<smem>>
    return
  }
}

</mosaic_0001>

<bundles_post_ra>
// kernel: tpu_custom_call.1
= control target key start
LH: loop header
LB: loop body
LE: loop exit
PB: predicated region body
PF: predicated region fallthrough
CT: control target
= control target key end

     0   :  { %6 = vsyncpa [#allocation3], 0  ;;  %s238_s0 = inlined_call_operand.hbm [shape: f32[8,32], index: 0, kind: input, shape index: {}]   ;;  %s239_s1 = inlined_call_operand.hbm [shape: f32[1,1], index: 1, kind: output, shape index: {}]  }
   0x1   :  { %7 = vsyncpa [#allocation4], 0  ;;  %s214_s6 = smov [#allocation2]  }
   0x2   :  { %s14_s7 = sshll.u32 %s214_s6, 4  ;;  %s15_s7 = int_to_ptr.vmem [resolvable:$true] %s14_s7 }
   0x3   :  { %s190_s8 = scalar_lea.vmem %s15_s7, 128  ;;  %p195_p1 = scmp.lt.s32.totalorder %s15_s7, %s15_s7 }
   0x4   :  { %p191_p0 = scmp.ne.s32.totalorder %s15_s7, %s190_s8  ;;  %p196_p2 = scmp.lt.s32.totalorder %s190_s8, %s190_s8 }
   0x6   :  { %p197_p3 = por %p196_p2, %p195_p1 }
   0x8   :  { %p198_p4 = pnand %p197_p3, %p191_p0 }
   0xa   :  { %201 = shalt.err (!%p198_p4)
}
   0xb   :  { %17 = dma.hbm_to_vmem [thread:$0]  %s238_s0, 128, %s15_s7, [#allocation3]  }
   0xc   :  { %210 = dma.done.wait [#allocation3], 128  }
   0xd   :  { %211 = vsyncadd [#allocation3], 4294967168  ;;  %v21_v0 = vld [vmem:[#allocation2] sm:$0xff]  ;;  %vm23_vm0 = vcmask 261120   ;;  %v215_v3 = vmov 0.0   ;;  %vm216_vm1 = vmmov 0  }
   0xe   :  { %v22_v1 = vmul.f32 %v21_v0, %v21_v0  ;;  %167 = vmatprep.subr.mxu0 %v215_v3  ;;  %169 = vmatprep.mubr.msk.f32.mxu0 %vm216_vm1, %v215_v3  ;;  %vm112_vm2 = vcmask 7168   ;;  %vm108_vm3 = vcmask 64512   ;;  %s217_s15 = smov [#allocation5]  }
  0x10   :  { %v24_v2 = vsel %vm23_vm0, %v22_v1, 0.0 }
  0x11   :  { %25 = vadd.xlane.f32.xlu0 %v24_v2 }
  0x9a   :  { %v26_v4 = vpop.xlane.xlu0 %25 }
  0x9b   :  { %v27_v5 = vmax.f32 %v26_v4, 1e-24 }
  0x9d   :  { %180 = vrsqrt.f32 %v27_v5 }
  0xaa   :  { %v181_v6 = vpop.eup %180 }
  0xab   :  { %v29_v7 = vmul.f32 %v181_v6, %v21_v0 }
  0xad   :  { %168 = vmatpush3.xpose.msk.msra.mxu0 %vm23_vm0, %v29_v7  ;;  %v123_v8 = vmul.f32 %v29_v7, %v29_v7 }
  0xaf   :  { %v124_v9 = vsel %vm23_vm0, %v123_v8, 0.0 }
  0xb0   :  { %125 = vadd.xlane.f32.xlu0 %v124_v9  ;;  %170 = vmatmul.mubr.msk.f32.vlgmr.msra.gmra.mxu0 %vm23_vm0, %v29_v7 }
 0x139   :  { %v126_v10 = vpop.xlane.xlu0 %125 }
 0x13a   :  { %v127_v11 = vsub.f32 1.0, %v126_v10 }
 0x13c   :  { %v128_v12 = vmul.f32 0.5, %v127_v11 }
 0x13e   :  { %v129_v13 = vsub.f32 0.5, %v128_v12 }
 0x140   :  { %v130_v14 = vmax.f32 %v129_v13, 0.0 }
 0x142   :  { %v131_v15 = vmul.f32 %v130_v14, %v130_v14 }
 0x144   :  { %v132_v16 = vsel %vm112_vm2, %v131_v15, 0.0 }
 0x145   :  { %133 = vadd.xlane.f32.xlu0 %v132_v16 }
 0x170   :  { %v99_v17 = vpop.f32.mrf.mxu0 }
 0x171   :  { %v103_v18 = vsub.f32 1.0, %v99_v17 }
 0x172   :  { %v171_v19 = vpop.f32.mrf.mxu0 }
 0x173   :  { %v104_v20 = vmul.f32 0.5, %v103_v18 }
 0x175   :  { %v105_v21 = vsub.f32 0.5, %v104_v20 }
 0x177   :  { %v106_v22 = vmax.f32 %v105_v21, 0.0 }
 0x179   :  { %v107_v23 = vmul.f32 %v106_v22, %v106_v22 }
 0x17b   :  { %v109_v24 = vsel %vm108_vm3, %v107_v23, 0.0 }
 0x17c   :  { %110 = vadd.xlane.f32.xlu1 %v109_v24 }
 0x1ce   :  { %v134_v27 = vpop.xlane.xlu0 %133 }
 0x1cf   :  { %v135_v28 = vrot.slane %v134_v27, 4 }
 0x1d1   :  { %v136_v29 = vadd.f32 %v135_v28, %v134_v27 }
 0x1d3   :  { %v137_v30 = vrot.slane %v136_v29, 2 }
 0x1d5   :  { %v138_v34 = vadd.f32 %v137_v30, %v136_v29 }
 0x1d7   :  { %v139_v37 = vrot.slane %v138_v34, 1 }
 0x1d9   :  { %v140_v40 = vadd.f32 %v139_v37, %v138_v34 }
 0x205   :  { %v111_v25 = vpop.xlane.xlu1 %110 }
 0x206   :  { %v113_v26 = vsel %vm112_vm2, %v111_v25, 0.0 }
 0x207   :  { %114 = vadd.xlane.f32.xlu1 %v113_v26 }
 0x290   :  { %v115_v31 = vpop.xlane.xlu1 %114 }
 0x291   :  { %v116_v32 = vrot.slane %v115_v31, 4 }
 0x293   :  { %v117_v33 = vadd.f32 %v116_v32, %v115_v31 }
 0x295   :  { %v118_v35 = vrot.slane %v117_v33, 2 }
 0x297   :  { %v119_v36 = vadd.f32 %v118_v35, %v117_v33 }
 0x299   :  { %v120_v38 = vrot.slane %v119_v36, 1 }
 0x29b   :  { %v121_v39 = vadd.f32 %v120_v38, %v119_v36 }
 0x29d   :  { %172 = vpush %v121_v39 }
 0x29e   :  { %174 = vpush %v140_v40 }
 0x2ce   :  { %s173_s0 = spop %172 }
 0x2cf   :  { %s175_s11 = spop %174 }
 0x2d0   :  { %s142_s12 = ssub.f32 %s173_s0, %s175_s11 }
 0x2d2   :  { %s143_s13 = sadd.f32 2.0, %s142_s12 }
 0x2d4   :  { %s146_s14 = smul.f32 0.015625, %s143_s13 }
 0x2d6   :  { %148 = sst [smem:[#allocation5]] %s146_s14 }
 0x2d7   :  { %156 = dma.smem_to_hbm %s217_s15, 16, %s239_s1, [#allocation4]  }
 0x2d8   :  { %212 = dma.done.wait [#allocation4], 16  }
 0x2d9   :  { %213 = vsyncadd [#allocation4], 4294967280 }
 0x2da   :  { %160 = sfence }
 0x2db   :  { %161 = vsyncpa [#allocation3], 1 }
 0x2dc   :  { %162 = vsyncpa [#allocation4], 1 }

</bundles_post_ra>
